<compile_context>
chip_gen: v5e
topology: v5e:2x2
jax: 0.10.0
libtpu: 0.0.40
codegen_flags: <defaults>
</compile_context>

<pallas_src>
import functools

import jax
import jax.numpy as jnp
from jax.experimental import pallas as pl
from jax.experimental.pallas import tpu as pltpu


def _round_up(x, m):
    return (x + m - 1) // m * m


def _cdiv(a, b):
    return (a + b - 1) // b


# ----------------------------- Pallas kernel --------------------------------
def _segmentor_kernel(patches_ref, w1_ref, b1_ref, w2_ref, b2_ref, out_ref):
    # Fused backbone patch-conv + bias + ReLU, then 1x1-conv classifier + bias.
    #   patches: (TM, K)        bf16  (already pixel-normalized)
    #   w1:      (K, HID_PAD)   bf16    b1: (1, HID_PAD) f32
    #   w2:      (HID_PAD, NC)  bf16    b2: (1, NC)      f32
    #   out:     (TM, NC)       bf16
    # Both matmuls are bf16 on the MXU with f32 accumulation (zero padding of
    # the hidden dim is exact).
    h = jnp.dot(patches_ref[...], w1_ref[...],
                preferred_element_type=jnp.float32)            # (TM, HID_PAD) f32
    h = jnp.maximum(h + b1_ref[...], 0.0)
    logits = jnp.dot(h.astype(jnp.bfloat16), w2_ref[...],
                     preferred_element_type=jnp.float32)       # (TM, NC) f32
    out_ref[...] = (logits + b2_ref[...]).astype(out_ref.dtype)


def _fused_head(patches, w1, b1, w2, b2, *, tile_m):
    M, K = patches.shape           # M already padded to a multiple of tile_m
    HID = w1.shape[1]              # padded to 128 (lane-dense hidden activations)
    NC = w2.shape[1]               # true #classes -> only real logit bytes hit HBM
    grid_m = M // tile_m
    return pl.pallas_call(
        _segmentor_kernel,
        out_shape=jax.ShapeDtypeStruct((M, NC), jnp.bfloat16),
        grid_spec=pltpu.PrefetchScalarGridSpec(
            num_scalar_prefetch=0,
            grid=(grid_m,),
            in_specs=[
                pl.BlockSpec((tile_m, K), lambda i: (i, 0)),   # patches (streamed over M)
                # Constant-index blocks below are fetched once and stay resident:
                # Pallas only re-issues a DMA when a block index changes.
                pl.BlockSpec((K, HID), lambda i: (0, 0)),      # backbone weight (bf16)
                pl.BlockSpec((1, HID), lambda i: (0, 0)),      # backbone bias   (f32)
                pl.BlockSpec((HID, NC), lambda i: (0, 0)),     # classifier weight (bf16)
                pl.BlockSpec((1, NC), lambda i: (0, 0)),       # classifier bias   (f32)
            ],
            out_specs=pl.BlockSpec((tile_m, NC), lambda i: (i, 0)),
        ),
        compiler_params=pltpu.CompilerParams(
            dimension_semantics=("parallel",),
            vmem_limit_bytes=32 * 1024 * 1024),
    )(patches, w1, b1, w2, b2)


def _choose_tile_m(M, desired):
    """Large tiles amortize the ~0.35us/step grid overhead; multiples of 256
    avoid partial MXU row tiles on the 256-wide v6e/v7x MXU.  Cap so large
    inputs keep >=4 grid steps (both v7x TensorCores get several steps).
    Working set ~= tile_m * 0.75 KiB (~3 MiB at 4096) << every VMEM limit."""
    if M <= 256:
        return _round_up(max(M, 16), 16)
    tile = min(_round_up(desired, 256), _round_up(M, 256))
    while tile > 256 and _cdiv(M, tile) < 4:
        tile -= 256
    return tile


# ------------------------------ JAX wrapper ----------------------------------
def semantic_segmentor_forward(images_nchw, params, *, desired_tile_m=4096):
    """Forward pass: NCHW images -> per-pixel class logits (N, K, H, W)."""
    N, C, H, W = images_nchw.shape
    P = params["patch"]
    Hp, Wp = H // P, W // P
    HID = params["w1"].shape[1]
    NC = params["w2"].shape[1]
    K = P * P * C

    # --- pixel normalization (f32) -> bf16 cast -> im2col patchify -----------
    # Normalizing before the cast keeps bf16 quantization error in normalized
    # units; XLA fuses the elementwise ops into the transpose below, so only a
    # bf16 patches array ever hits HBM.
    # TODO(synk): fuse the patchify into the kernel via an NHWC row-slab BlockSpec
    # so the (M, K) patches array never materializes at all.
    x = (images_nchw - params["pixel_mean"][None, :, None, None]) \
        / params["pixel_std"][None, :, None, None]
    x = x.astype(jnp.bfloat16)
    x = jnp.transpose(x, (0, 2, 3, 1))                           # (N, H, W, C)
    x = x.reshape(N, Hp, P, Wp, P, C)
    x = jnp.transpose(x, (0, 1, 3, 2, 4, 5))                     # (N, Hp, Wp, P, P, C)
    patches = x.reshape(N * Hp * Wp, K)                          # (M, K) bf16

    # --- pad hidden dim to 128 lanes (zero padding: exact), bf16 weights -----
    HID_PAD = _round_up(HID, 128)
    w1p = jnp.pad(params["w1"], ((0, 0), (0, HID_PAD - HID))).astype(jnp.bfloat16)
    b1p = jnp.pad(params["b1"].reshape(1, -1), ((0, 0), (0, HID_PAD - HID)))
    w2p = jnp.pad(params["w2"], ((0, HID_PAD - HID), (0, 0))).astype(jnp.bfloat16)
    b2p = params["b2"].reshape(1, -1)

    # --- adaptive tile_m + tail padding (correct for any M) ------------------
    M = patches.shape[0]
    tile_m = _choose_tile_m(M, desired_tile_m)
    grid_m = _cdiv(M, tile_m)
    M_pad = grid_m * tile_m
    if M_pad != M:
        patches = jnp.pad(patches, ((0, M_pad - M), (0, 0)))

    logits_flat = _fused_head(patches, w1p, b1p, w2p, b2p, tile_m=tile_m)
    logits = logits_flat[:M].astype(jnp.float32).reshape(N, Hp, Wp, NC)

    # sem_seg head upsample + sem_seg_postprocess: bilinear resize to image
    # resolution.  The *small* low-res logits are transposed to NCHW first so the
    # full-resolution array is written directly in NCHW (no post-resize
    # full-image transpose).
    # TODO(synk): fuse the PxP bilinear expand into the kernel epilogue (it
    # dominates end-to-end HBM traffic at real resolutions).
    logits = jnp.transpose(logits, (0, 3, 1, 2))                 # (N, NC, Hp, Wp)
    logits = jax.image.resize(logits, (N, NC, H, W), method="bilinear")
    return logits                                                # (N, NC, H, W) f32


# ------------------------------ reference ------------------------------------
def _reference_forward(images_nchw, params):
    N, C, H, W = images_nchw.shape
    P = params["patch"]
    Hp, Wp = H // P, W // P
    x = (images_nchw - params["pixel_mean"][None, :, None, None]) \
        / params["pixel_std"][None, :, None, None]
    x = jnp.transpose(x, (0, 2, 3, 1)).reshape(N, Hp, P, Wp, P, C)
    x = jnp.transpose(x, (0, 1, 3, 2, 4, 5)).reshape(N * Hp * Wp, P * P * C)
    h = jnp.maximum(x @ params["w1"] + params["b1"], 0.0)
    logits = (h @ params["w2"] + params["b2"]).reshape(N, Hp, Wp, -1)
    logits = jax.image.resize(logits, (N, H, W, logits.shape[-1]), method="bilinear")
    return jnp.transpose(logits, (0, 3, 1, 2))


# --------------------------------- main ---------------------------------------
if __name__ == "__main__":
    N, C, H, W = 2, 3, 16, 16          # small image batch (NCHW, like torch)
    P = 4                              # backbone patch-conv stride / kernel
    HID = 32                           # backbone feature channels
    NUM_CLASSES = 8                    # sem_seg head classes

    key = jax.random.PRNGKey(0)
    k_img, k_w1, k_b1, k_w2, k_b2 = jax.random.split(key, 5)

    images = jax.random.normal(k_img, (N, C, H, W), dtype=jnp.float32) * 50.0 + 100.0

    K = P * P * C
    params = {
        "patch": P,
        "pixel_mean": jnp.array([103.53, 116.28, 123.675], dtype=jnp.float32),
        "pixel_std": jnp.array([57.375, 57.12, 58.395], dtype=jnp.float32),
        "w1": jax.random.normal(k_w1, (K, HID), dtype=jnp.float32) * 0.05,
        "b1": jax.random.normal(k_b1, (1, HID), dtype=jnp.float32) * 0.01,
        "w2": jax.random.normal(k_w2, (HID, NUM_CLASSES), dtype=jnp.float32) * 0.05,
        "b2": jax.random.normal(k_b2, (1, NUM_CLASSES), dtype=jnp.float32) * 0.01,
    }

    out = jax.jit(functools.partial(semantic_segmentor_forward, params=params))(images)
    out = jax.block_until_ready(out)

    ref = _reference_forward(images, params)
    assert out.shape == (N, NUM_CLASSES, H, W), out.shape
    # bf16 streaming operands / weights / logits -> relaxed tolerance vs pure-f32 ref.
    assert jnp.allclose(out, ref, atol=3e-2, rtol=3e-2), "mismatch vs JAX reference"

    print("KERNEL_OK")
</pallas_src>

<mosaic_0001>
module attributes {stable_mosaic.version = 11 : i64} {
  func.func @_segmentor_kernel(%arg0: i32, %arg1: memref<32x48xbf16, #tpu.memory_space<vmem>>, %arg2: memref<48x128xbf16, #tpu.memory_space<vmem>>, %arg3: memref<1x128xf32, #tpu.memory_space<vmem>>, %arg4: memref<128x8xbf16, #tpu.memory_space<vmem>>, %arg5: memref<1x8xf32, #tpu.memory_space<vmem>>, %arg6: memref<32x8xbf16, #tpu.memory_space<vmem>>) attributes {dimension_semantics = [#tpu.dimension_semantics<parallel>], iteration_bounds = array<i64: 1>, scalar_prefetch = 0 : i64, scratch_operands = 0 : i64, tpu.core_type = #tpu.core_type<tc>, window_params = [{transform_indices = @transform_0, window_bounds = array<i64: 32, 48>}, {pipeline_mode = #tpu.pipeline_mode<synchronous>, transform_indices = @transform_1, window_bounds = array<i64: 48, 128>}, {pipeline_mode = #tpu.pipeline_mode<synchronous>, transform_indices = @transform_2, window_bounds = array<i64: 1, 128>}, {pipeline_mode = #tpu.pipeline_mode<synchronous>, transform_indices = @transform_3, window_bounds = array<i64: 128, 8>}, {pipeline_mode = #tpu.pipeline_mode<synchronous>, transform_indices = @transform_4, window_bounds = array<i64: 1, 8>}, {transform_indices = @transform_5, window_bounds = array<i64: 32, 8>}]} {
    %c0 = arith.constant 0 : index
    %c0_0 = arith.constant 0 : index
    %0 = vector.load %arg1[%c0, %c0_0] : memref<32x48xbf16, #tpu.memory_space<vmem>>, vector<32x48xbf16>
    %c0_1 = arith.constant 0 : index
    %c0_2 = arith.constant 0 : index
    %1 = vector.load %arg2[%c0_1, %c0_2] : memref<48x128xbf16, #tpu.memory_space<vmem>>, vector<48x128xbf16>
    %cst = arith.constant dense<0.000000e+00> : vector<32x128xf32>
    %2 = tpu.matmul %0, %1, %cst {dimension_numbers = #tpu.dot_dimension_numbers<[1], [0], [0], [1], [0, 0, 1, 1], [], []>} : vector<32x48xbf16>, vector<48x128xbf16>, vector<32x128xf32> -> vector<32x128xf32>
    %c0_3 = arith.constant 0 : index
    %c0_4 = arith.constant 0 : index
    %3 = vector.load %arg3[%c0_3, %c0_4] : memref<1x128xf32, #tpu.memory_space<vmem>>, vector<1x128xf32>
    %4 = vector.broadcast %3 : vector<1x128xf32> to vector<32x128xf32>
    %5 = arith.addf %2, %4 : vector<32x128xf32>
    %cst_5 = arith.constant 0.000000e+00 : f32
    %6 = vector.broadcast %cst_5 : f32 to vector<32x128xf32>
    %7 = arith.maximumf %5, %6 : vector<32x128xf32>
    %8 = arith.truncf %7 : vector<32x128xf32> to vector<32x128xbf16>
    %c0_6 = arith.constant 0 : index
    %c0_7 = arith.constant 0 : index
    %9 = vector.load %arg4[%c0_6, %c0_7] : memref<128x8xbf16, #tpu.memory_space<vmem>>, vector<128x8xbf16>
    %cst_8 = arith.constant dense<0.000000e+00> : vector<32x8xf32>
    %10 = tpu.matmul %8, %9, %cst_8 {dimension_numbers = #tpu.dot_dimension_numbers<[1], [0], [0], [1], [0, 0, 1, 1], [], []>} : vector<32x128xbf16>, vector<128x8xbf16>, vector<32x8xf32> -> vector<32x8xf32>
    %c0_9 = arith.constant 0 : index
    %c0_10 = arith.constant 0 : index
    %11 = vector.load %arg5[%c0_9, %c0_10] : memref<1x8xf32, #tpu.memory_space<vmem>>, vector<1x8xf32>
    %12 = vector.broadcast %11 : vector<1x8xf32> to vector<32x8xf32>
    %13 = arith.addf %10, %12 : vector<32x8xf32>
    %14 = arith.truncf %13 : vector<32x8xf32> to vector<32x8xbf16>
    %c0_11 = arith.constant 0 : index
    %c0_12 = arith.constant 0 : index
    %15 = vector.load %arg6[%c0_11, %c0_12] : memref<32x8xbf16, #tpu.memory_space<vmem>>, vector<32x8xbf16>
    tpu.vector_store %arg6[%c0_11, %c0_12], %14 {strides = array<i32>} : memref<32x8xbf16, #tpu.memory_space<vmem>>, vector<32x8xbf16>,
    return
  }
  func.func @transform_0(%arg0: i32) -> (i32, i32) {
    %c0_i32 = arith.constant 0 : i32
    %c0_i32_0 = arith.constant 0 : i32
    return %arg0, %c0_i32 : i32, i32
  }
  func.func @transform_1(%arg0: i32) -> (i32, i32) {
    %c0_i32 = arith.constant 0 : i32
    %c0_i32_0 = arith.constant 0 : i32
    %c0_i32_1 = arith.constant 0 : i32
    return %c0_i32, %c0_i32_0 : i32, i32
  }
  func.func @transform_2(%arg0: i32) -> (i32, i32) {
    %c0_i32 = arith.constant 0 : i32
    %c0_i32_0 = arith.constant 0 : i32
    %c0_i32_1 = arith.constant 0 : i32
    return %c0_i32, %c0_i32_0 : i32, i32
  }
  func.func @transform_3(%arg0: i32) -> (i32, i32) {
    %c0_i32 = arith.constant 0 : i32
    %c0_i32_0 = arith.constant 0 : i32
    %c0_i32_1 = arith.constant 0 : i32
    return %c0_i32, %c0_i32_0 : i32, i32
  }
  func.func @transform_4(%arg0: i32) -> (i32, i32) {
    %c0_i32 = arith.constant 0 : i32
    %c0_i32_0 = arith.constant 0 : i32
    %c0_i32_1 = arith.constant 0 : i32
    return %c0_i32, %c0_i32_0 : i32, i32
  }
  func.func @transform_5(%arg0: i32) -> (i32, i32) {
    %c0_i32 = arith.constant 0 : i32
    %c0_i32_0 = arith.constant 0 : i32
    return %arg0, %c0_i32 : i32, i32
  }
}

</mosaic_0001>

<bundles_post_ra>
// kernel: semantic_segmentor_forward.1
= control target key start
LH: loop header
LB: loop body
LE: loop exit
PB: predicated region body
PF: predicated region fallthrough
CT: control target
= control target key end

     0   :  { %vm63_vm0 = vcmask 392192   ;;  %vm186_vm1 = vcmask 60416   ;;  %s359_s1 = inlined_call_operand.vmem [shape: bf16[48,128], index: 1, kind: input, shape index: {}]   ;;  %s360_s3 = inlined_call_operand.vmem [shape: bf16[128,8], index: 3, kind: input, shape index: {}]   ;;  %s361_s2 = inlined_call_operand.vmem [shape: f32[1,128], index: 2, kind: input, shape index: {}]   ;;  %s362_s0 = inlined_call_operand.vmem [shape: bf16[32,48], index: 0, kind: input, shape index: {}]   ;;  %s363_s4 = inlined_call_operand.vmem [shape: f32[1,8], index: 4, kind: input, shape index: {}]   ;;  %s364_s5 = inlined_call_operand.vmem [shape: bf16[32,8], index: 5, kind: output, shape index: {}]  }
   0x1   :  { %v253_v0 = vld [vmem:[%s359_s1 + $0x10] sm:$0xff]  ;;  %v261_v1 = vld [vmem:[%s360_s3 + $0x38] sm:$0xff]  ;;  %v252_v2 = vld [vmem:[%s359_s1 + $0x8] sm:$0xff] }
   0x2   :  { %75 = vmatpush.bf16.msra.mxu0 %v253_v0  ;;  %163 = vmatpush.bf16.msra.mxu1 %v261_v1  ;;  %v260_v3 = vld [vmem:[%s360_s3 + $0x30] sm:$0xff]  ;;  %v251_v4 = vld [vmem:[%s359_s1] sm:$0xff]  ;;  %v259_v5 = vld [vmem:[%s360_s3 + $0x28] sm:$0xff] }
   0x3   :  { %262 = vmatpush.bf16.msra.mxu2 %v261_v1  ;;  %v249_v6 = vld [vmem:[%s362_s0] sm:$0xff]  ;;  %v250_v8 = vld [vmem:[%s362_s0 + $0x8] sm:$0xff]  ;;  %v257_v9 = vld [vmem:[%s360_s3 + $0x18] sm:$0xff] }
   0x4   :  { %v258_v7 = vld [vmem:[%s360_s3 + $0x20] sm:$0xff]  ;;  %v256_v10 = vld [vmem:[%s360_s3 + $0x10] sm:$0xff]  ;;  %v255_v11 = vld [vmem:[%s360_s3 + $0x8] sm:$0xff] }
   0x5   :  { %v254_v12 = vld [vmem:[%s360_s3] sm:$0xff] }
   0x6   :  { %76 = vmatpush.bf16.msra.mxu0 %v252_v2  ;;  %164 = vmatpush.bf16.msra.mxu1 %v260_v3  ;;  %v270_v14 = vld [vmem:[%s361_s2] ss:$0 sm:$0xff] }
   0x7   :  { %263 = vmatpush.bf16.msra.mxu2 %v260_v3  ;;  %v271_v28 = vld [vmem:[%s363_s4] ss:$0 sm:$0xff] }
   0xa   :  { %77 = vmatpush.bf16.msra.mxu0 %v251_v4  ;;  %165 = vmatpush.bf16.msra.mxu1 %v259_v5 }
   0xb   :  { %264 = vmatpush.bf16.msra.mxu2 %v259_v5 }
   0xd   :  { %215 = vmatmul.msk.bf16.vlgmr.msra.gmra.mxu0 %vm63_vm0, %v249_v6 }
   0xe   :  { %166 = vmatpush.bf16.msra.mxu1 %v258_v7 }
   0xf   :  { %265 = vmatpush.bf16.msra.mxu2 %v258_v7 }
  0x12   :  { %167 = vmatpush.bf16.msra.mxu1 %v257_v9 }
  0x13   :  { %266 = vmatpush.bf16.msra.mxu2 %v257_v9 }
  0x16   :  { %168 = vmatpush.bf16.msra.mxu1 %v256_v10 }
  0x17   :  { %267 = vmatpush.bf16.msra.mxu2 %v256_v10 }
  0x1a   :  { %169 = vmatpush.bf16.msra.mxu1 %v255_v11 }
  0x1b   :  { %268 = vmatpush.bf16.msra.mxu2 %v255_v11 }
  0x1d   :  { %216 = vmatmul.msk.bf16.gmra.mxu0 %vm63_vm0, %v250_v8 }
  0x1e   :  { %170 = vmatpush.bf16.msra.mxu1 %v254_v12 }
  0x1f   :  { %269 = vmatpush.bf16.msra.mxu2 %v254_v12 }
  0x8a   :  { %v79_v13 = vpop.f32.mrf.mxu0 }
  0x8b   :  { %v80_v15 = vadd.f32 %v270_v14, %v79_v13 }
  0x8d   :  { %v89_v18 = vmax.f32 %v80_v15, 0.0 }
  0x92   :  { %v81_v16 = vpop.f32.mrf.mxu0 }
  0x93   :  { %v82_v17 = vadd.f32 %v270_v14, %v81_v16 }
  0x95   :  { %v90_v19 = vmax.f32 %v82_v17, 0.0 }
  0x97   :  { %v93_v20 = vpack.c.bf16 %v90_v19, %v89_v18 }
  0x99   :  { %171 = vmatmul.bf16.vlgmr.msra.gmra.mxu1 %v93_v20 }
  0x9a   :  { %v84_v21 = vpop.f32.mrf.mxu0 }
  0x9b   :  { %v85_v22 = vadd.f32 %v270_v14, %v84_v21 }
  0x9d   :  { %v91_v25 = vmax.f32 %v85_v22, 0.0 }
  0xa2   :  { %v86_v23 = vpop.f32.mrf.mxu0 }
  0xa3   :  { %v87_v24 = vadd.f32 %v270_v14, %v86_v23 }
  0xa5   :  { %v92_v26 = vmax.f32 %v87_v24, 0.0 }
  0xa7   :  { %v94_v27 = vpack.c.bf16 %v92_v26, %v91_v25 }
  0xa9   :  { %176 = vmatmul.bf16.vlgmr.msra.gmra.mxu2 %v94_v27 }
 0x116   :  { %v172_v29 = vpop.f32.mrf.mxu1 }
 0x117   :  { %v173_v30 = vadd.f32 %v271_v28, %v172_v29 }
 0x119   :  { %v182_v31 = vpack.c.bf16 %v173_v30, %v173_v30 }
 0x11b   :  { %187 = vst.msk [vmem:[%s364_s5] sm:$0xf] %vm186_vm1, %v182_v31 }
 0x11e   :  { %v174_v32 = vpop.f32.mrf.mxu1 }
 0x11f   :  { %v175_v33 = vadd.f32 %v271_v28, %v174_v32 }
 0x121   :  { %v183_v34 = vpack.c.bf16 %v175_v33, %v175_v33 }
 0x123   :  { %188 = vst.msk [vmem:[%s364_s5 + $0x4] sm:$0xf] %vm186_vm1, %v183_v34 }
 0x12c   :  { %v177_v35 = vpop.f32.mrf.mxu2 }
 0x12d   :  { %v178_v36 = vadd.f32 %v271_v28, %v177_v35 }
 0x12f   :  { %v184_v37 = vpack.c.bf16 %v178_v36, %v178_v36 }
 0x131   :  { %189 = vst.msk [vmem:[%s364_s5 + $0x8] sm:$0xf] %vm186_vm1, %v184_v37 }
 0x134   :  { %v179_v38 = vpop.f32.mrf.mxu2 }
 0x135   :  { %v180_v39 = vadd.f32 %v271_v28, %v179_v38 }
 0x137   :  { %v185_v40 = vpack.c.bf16 %v180_v39, %v180_v39 }
 0x139   :  { %190 = vst.msk [vmem:[%s364_s5 + $0xc] sm:$0xf] %vm186_vm1, %v185_v40 }

</bundles_post_ra>
